<compile_context>
chip_gen: v6e
topology: v6e:2x2x1
jax: 0.10.0
libtpu: 0.0.40
codegen_flags: <defaults>
</compile_context>

<pallas_src>
import functools

import jax
import jax.numpy as jnp
from jax.experimental import pallas as pl
from jax.experimental.pallas import tpu as pltpu


def _mha_map_kernel(q_ref, k_ref, wq_ref, bq_ref, wk_ref, bk_ref, out_ref,
                    scores_ref, *, num_heads, head_dim, hw):
    # q_ref  : (1, TQ, D)         k_ref : (1, D, HW)
    # wq_ref : (D, Hid)   (pre-transposed, normalize_fact folded in)
    # bq_ref : (1, Hid)   (normalize_fact folded in)
    # wk_ref : (Hid, D)   (original Linear layout)
    # bk_ref : (Hid, 1)
    # out_ref: (1, TQ, num_heads*HW) bf16
    # scores_ref: (TQ, num_heads*HW) f32 VMEM scratch
    qb = q_ref[0]                                    # [TQ, D]
    kb = k_ref[0]                                    # [D, HW]

    # q projection (scale already folded into weights/bias): [TQ, Hid]
    qp = jnp.dot(qb, wq_ref[...], preferred_element_type=jnp.float32) + bq_ref[...]
    # k projection as 1x1 conv, transposed form: [Hid, HW]  (HW stays on lanes)
    kp = jnp.dot(wk_ref[...], kb, preferred_element_type=jnp.float32) + bk_ref[...]

    # Per-head scores written straight into lane-aligned scratch slots.
    # Head-major ordering along the last axis matches torch flatten(2).
    for n in range(num_heads):
        lo = n * head_dim
        qn = qp[:, lo:lo + head_dim]                 # [TQ, c]
        kn = kp[lo:lo + head_dim, :]                 # [c, HW]  (sublane slice)
        scores_ref[:, n * hw:(n + 1) * hw] = jnp.dot(
            qn, kn, preferred_element_type=jnp.float32)          # [TQ, HW]

    # softmax over the joint (heads, H, W) axis; all math in f32.
    scores = scores_ref[...]                         # [TQ, N*HW]
    m = jnp.max(scores, axis=-1, keepdims=True)
    e = jnp.exp(scores - m)
    s = jnp.sum(e, axis=-1, keepdims=True)
    out_ref[0] = (e * pl.reciprocal(s, approx=True)).astype(out_ref.dtype)


def mh_attention_map(q, k, wq, bq, wk, bk, *, num_heads, hidden_dim,
                     out_dtype=jnp.bfloat16):
    """q: [B, Q, D];  k: [B, D, H, W] (NCHW);  wq/wk: [Hid, D]; bq/bk: [Hid]."""
    B, Q, D = q.shape
    _, Dk, H, W = k.shape
    assert D == Dk
    HW = H * W
    head_dim = hidden_dim // num_heads
    normalize_fact = float(hidden_dim / num_heads) ** (-0.5)

    # Free reshape only (no transpose, no extra HBM pass through k).
    k_flat = k.reshape(B, D, HW)

    # Fold the query scale into the q weights/bias once, on the host.
    wq_t = (wq.T * normalize_fact).astype(jnp.float32)      # [D, Hid]
    bq2 = (bq * normalize_fact).reshape(1, hidden_dim)      # [1, Hid]
    wk2 = wk.astype(jnp.float32)                            # [Hid, D]
    bk2 = bk.reshape(hidden_dim, 1)                         # [Hid, 1]

    # Q-tile size: whole Q if it fits a vreg-friendly tile, else 128 (mult of 8).
    TQ = Q if Q <= 128 else 128
    n_q_tiles = pl.cdiv(Q, TQ)

    kernel = functools.partial(
        _mha_map_kernel,
        num_heads=num_heads,
        head_dim=head_dim,
        hw=HW,
    )

    out_flat = pl.pallas_call(
        kernel,
        out_shape=jax.ShapeDtypeStruct((B, Q, num_heads * HW), out_dtype),
        grid_spec=pltpu.PrefetchScalarGridSpec(
            num_scalar_prefetch=0,
            grid=(B, n_q_tiles),
            in_specs=[
                pl.BlockSpec((1, TQ, D), lambda b, t: (b, t, 0)),
                pl.BlockSpec((1, D, HW), lambda b, t: (b, 0, 0)),
                pl.BlockSpec((D, hidden_dim), lambda b, t: (0, 0)),
                pl.BlockSpec((1, hidden_dim), lambda b, t: (0, 0)),
                pl.BlockSpec((hidden_dim, D), lambda b, t: (0, 0)),
                pl.BlockSpec((hidden_dim, 1), lambda b, t: (0, 0)),
            ],
            out_specs=pl.BlockSpec((1, TQ, num_heads * HW),
                                   lambda b, t: (b, t, 0)),
            scratch_shapes=[pltpu.VMEM((TQ, num_heads * HW), jnp.float32)],
        ),
        compiler_params=pltpu.CompilerParams(
            dimension_semantics=("parallel", "parallel")),
    )(q, k_flat, wq_t, bq2, wk2, bk2)

    # TODO(synk): optional `mask` branch (masked_fill -inf) not implemented (mask=None path).
    # Dropout p=0.0 -> identity, so it is omitted.
    return out_flat.reshape(B, Q, num_heads, H, W)


def _reference(q, k, wq, bq, wk, bk, *, num_heads, hidden_dim):
    """Pure-JAX (f32) replica of the PyTorch forward for validation."""
    norm = float(hidden_dim / num_heads) ** (-0.5)
    B, D, H, W = k.shape
    qp = q @ wq.T + bq                              # [B, Q, Hid]
    kp = jnp.einsum("bdhw,ed->behw", k, wk) + bk[None, :, None, None]
    c = hidden_dim // num_heads
    qh = qp.reshape(B, qp.shape[1], num_heads, c)
    kh = kp.reshape(B, num_heads, c, H, W)
    w = jnp.einsum("bqnc,bnchw->bqnhw", qh * norm, kh)
    wf = jax.nn.softmax(w.reshape(B, w.shape[1], -1), axis=-1)
    return wf.reshape(w.shape)


if __name__ == "__main__":
    # Small shapes consistent with the module's forward.
    B, Q = 2, 8            # batch, num queries
    query_dim = 4          # channels of q (last dim) and of k (NCHW C dim)
    hidden_dim = 32
    num_heads = 8
    H = W = 16

    key = jax.random.PRNGKey(0)
    kq, kk, kwq, kwk = jax.random.split(key, 4)

    q = jax.random.normal(kq, (B, Q, query_dim), dtype=jnp.float32)
    k = jax.random.normal(kk, (B, query_dim, H, W), dtype=jnp.float32)

    # Deterministic parameter init: xavier_uniform weights, zero biases.
    bound = (6.0 / (query_dim + hidden_dim)) ** 0.5
    wq = jax.random.uniform(kwq, (hidden_dim, query_dim), jnp.float32, -bound, bound)
    wk = jax.random.uniform(kwk, (hidden_dim, query_dim), jnp.float32, -bound, bound)
    bq = jnp.zeros((hidden_dim,), jnp.float32)
    bk = jnp.zeros((hidden_dim,), jnp.float32)

    out = mh_attention_map(q, k, wq, bq, wk, bk,
                           num_heads=num_heads, hidden_dim=hidden_dim)
    out = jax.block_until_ready(out)

    ref = _reference(q, k, wq, bq, wk, bk,
                     num_heads=num_heads, hidden_dim=hidden_dim)
    ref = jax.block_until_ready(ref)

    assert out.shape == (B, Q, num_heads, H, W), out.shape
    assert out.dtype == jnp.bfloat16, out.dtype
    out_f32 = out.astype(jnp.float32)
    # bf16 output + approx reciprocal -> relaxed tolerance (f32 math inside).
    err = float(jnp.max(jnp.abs(out_f32 - ref)))
    assert jnp.allclose(out_f32, ref, rtol=2e-2, atol=1e-4), err
    # Each softmax row must sum to ~1.
    row_sums = jnp.sum(out_f32.reshape(B, Q, -1), axis=-1)
    assert jnp.allclose(row_sums, 1.0, rtol=1e-2, atol=1e-2), row_sums

    print("KERNEL_OK")
</pallas_src>

<mosaic_0001>
module attributes {stable_mosaic.version = 11 : i64} {
  func.func @_mha_map_kernel(%arg0: i32, %arg1: i32, %arg2: memref<1x8x4xf32, #tpu.memory_space<vmem>>, %arg3: memref<1x4x256xf32, #tpu.memory_space<vmem>>, %arg4: memref<4x32xf32, #tpu.memory_space<vmem>>, %arg5: memref<1x32xf32, #tpu.memory_space<vmem>>, %arg6: memref<32x4xf32, #tpu.memory_space<vmem>>, %arg7: memref<32x1xf32, #tpu.memory_space<vmem>>, %arg8: memref<1x8x2048xbf16, #tpu.memory_space<vmem>>, %arg9: memref<8x2048xf32, #tpu.memory_space<vmem>>) attributes {dimension_semantics = [#tpu.dimension_semantics<parallel>, #tpu.dimension_semantics<parallel>], iteration_bounds = array<i64: 2, 1>, scalar_prefetch = 0 : i64, scratch_operands = 1 : i64, tpu.core_type = #tpu.core_type<tc>, window_params = [{transform_indices = @transform_0, window_bounds = array<i64: 1, 8, 4>}, {transform_indices = @transform_1, window_bounds = array<i64: 1, 4, 256>}, {pipeline_mode = #tpu.pipeline_mode<synchronous>, transform_indices = @transform_2, window_bounds = array<i64: 4, 32>}, {pipeline_mode = #tpu.pipeline_mode<synchronous>, transform_indices = @transform_3, window_bounds = array<i64: 1, 32>}, {pipeline_mode = #tpu.pipeline_mode<synchronous>, transform_indices = @transform_4, window_bounds = array<i64: 32, 4>}, {pipeline_mode = #tpu.pipeline_mode<synchronous>, transform_indices = @transform_5, window_bounds = array<i64: 32, 1>}, {transform_indices = @transform_6, window_bounds = array<i64: 1, 8, 2048>}]} {
    %c0 = arith.constant 0 : index
    %c0_0 = arith.constant 0 : index
    %c0_1 = arith.constant 0 : index
    %0 = vector.load %arg2[%c0, %c0_0, %c0_1] : memref<1x8x4xf32, #tpu.memory_space<vmem>>, vector<1x8x4xf32>
    %1 = vector.shape_cast %0 : vector<1x8x4xf32> to vector<8x4xf32>
    %c0_2 = arith.constant 0 : index
    %c0_3 = arith.constant 0 : index
    %c0_4 = arith.constant 0 : index
    %2 = vector.load %arg3[%c0_2, %c0_3, %c0_4] : memref<1x4x256xf32, #tpu.memory_space<vmem>>, vector<1x4x256xf32>
    %3 = vector.shape_cast %2 : vector<1x4x256xf32> to vector<4x256xf32>
    %c0_5 = arith.constant 0 : index
    %c0_6 = arith.constant 0 : index
    %4 = vector.load %arg4[%c0_5, %c0_6] : memref<4x32xf32, #tpu.memory_space<vmem>>, vector<4x32xf32>
    %cst = arith.constant dense<0.000000e+00> : vector<8x32xf32>
    %5 = tpu.matmul %1, %4, %cst {dimension_numbers = #tpu.dot_dimension_numbers<[1], [0], [0], [1], [0, 0, 1, 1], [], []>} : vector<8x4xf32>, vector<4x32xf32>, vector<8x32xf32> -> vector<8x32xf32>
    %c0_7 = arith.constant 0 : index
    %c0_8 = arith.constant 0 : index
    %6 = vector.load %arg5[%c0_7, %c0_8] : memref<1x32xf32, #tpu.memory_space<vmem>>, vector<1x32xf32>
    %7 = vector.broadcast %6 : vector<1x32xf32> to vector<8x32xf32>
    %8 = arith.addf %5, %7 : vector<8x32xf32>
    %c0_9 = arith.constant 0 : index
    %c0_10 = arith.constant 0 : index
    %9 = vector.load %arg6[%c0_9, %c0_10] : memref<32x4xf32, #tpu.memory_space<vmem>>, vector<32x4xf32>
    %cst_11 = arith.constant dense<0.000000e+00> : vector<32x256xf32>
    %10 = tpu.matmul %9, %3, %cst_11 {dimension_numbers = #tpu.dot_dimension_numbers<[1], [0], [0], [1], [0, 0, 1, 1], [], []>} : vector<32x4xf32>, vector<4x256xf32>, vector<32x256xf32> -> vector<32x256xf32>
    %c0_12 = arith.constant 0 : index
    %c0_13 = arith.constant 0 : index
    %11 = vector.load %arg7[%c0_12, %c0_13] : memref<32x1xf32, #tpu.memory_space<vmem>>, vector<32x1xf32>
    %12 = vector.broadcast %11 : vector<32x1xf32> to vector<32x256xf32>
    %13 = arith.addf %10, %12 : vector<32x256xf32>
    %14 = vector.extract_strided_slice %8 {offsets = [0, 0], sizes = [8, 4], strides = [1, 1]} : vector<8x32xf32> to vector<8x4xf32>
    %15 = vector.extract_strided_slice %13 {offsets = [0, 0], sizes = [4, 256], strides = [1, 1]} : vector<32x256xf32> to vector<4x256xf32>
    %cst_14 = arith.constant dense<0.000000e+00> : vector<8x256xf32>
    %16 = tpu.matmul %14, %15, %cst_14 {dimension_numbers = #tpu.dot_dimension_numbers<[1], [0], [0], [1], [0, 0, 1, 1], [], []>} : vector<8x4xf32>, vector<4x256xf32>, vector<8x256xf32> -> vector<8x256xf32>
    %c0_15 = arith.constant 0 : index
    %c0_16 = arith.constant 0 : index
    %17 = vector.load %arg9[%c0_15, %c0_16] : memref<8x2048xf32, #tpu.memory_space<vmem>>, vector<8x256xf32>
    tpu.vector_store %arg9[%c0_15, %c0_16], %16 {strides = array<i32>} : memref<8x2048xf32, #tpu.memory_space<vmem>>, vector<8x256xf32>,
    %18 = vector.extract_strided_slice %8 {offsets = [0, 4], sizes = [8, 4], strides = [1, 1]} : vector<8x32xf32> to vector<8x4xf32>
    %19 = vector.extract_strided_slice %13 {offsets = [4, 0], sizes = [4, 256], strides = [1, 1]} : vector<32x256xf32> to vector<4x256xf32>
    %cst_17 = arith.constant dense<0.000000e+00> : vector<8x256xf32>
    %20 = tpu.matmul %18, %19, %cst_17 {dimension_numbers = #tpu.dot_dimension_numbers<[1], [0], [0], [1], [0, 0, 1, 1], [], []>} : vector<8x4xf32>, vector<4x256xf32>, vector<8x256xf32> -> vector<8x256xf32>
    %c0_18 = arith.constant 0 : index
    %c256 = arith.constant 256 : index
    %21 = vector.load %arg9[%c0_18, %c256] : memref<8x2048xf32, #tpu.memory_space<vmem>>, vector<8x256xf32>
    tpu.vector_store %arg9[%c0_18, %c256], %20 {strides = array<i32>} : memref<8x2048xf32, #tpu.memory_space<vmem>>, vector<8x256xf32>,
    %22 = vector.extract_strided_slice %8 {offsets = [0, 8], sizes = [8, 4], strides = [1, 1]} : vector<8x32xf32> to vector<8x4xf32>
    %23 = vector.extract_strided_slice %13 {offsets = [8, 0], sizes = [4, 256], strides = [1, 1]} : vector<32x256xf32> to vector<4x256xf32>
    %cst_19 = arith.constant dense<0.000000e+00> : vector<8x256xf32>
    %24 = tpu.matmul %22, %23, %cst_19 {dimension_numbers = #tpu.dot_dimension_numbers<[1], [0], [0], [1], [0, 0, 1, 1], [], []>} : vector<8x4xf32>, vector<4x256xf32>, vector<8x256xf32> -> vector<8x256xf32>
    %c0_20 = arith.constant 0 : index
    %c512 = arith.constant 512 : index
    %25 = vector.load %arg9[%c0_20, %c512] : memref<8x2048xf32, #tpu.memory_space<vmem>>, vector<8x256xf32>
    tpu.vector_store %arg9[%c0_20, %c512], %24 {strides = array<i32>} : memref<8x2048xf32, #tpu.memory_space<vmem>>, vector<8x256xf32>,
    %26 = vector.extract_strided_slice %8 {offsets = [0, 12], sizes = [8, 4], strides = [1, 1]} : vector<8x32xf32> to vector<8x4xf32>
    %27 = vector.extract_strided_slice %13 {offsets = [12, 0], sizes = [4, 256], strides = [1, 1]} : vector<32x256xf32> to vector<4x256xf32>
    %cst_21 = arith.constant dense<0.000000e+00> : vector<8x256xf32>
    %28 = tpu.matmul %26, %27, %cst_21 {dimension_numbers = #tpu.dot_dimension_numbers<[1], [0], [0], [1], [0, 0, 1, 1], [], []>} : vector<8x4xf32>, vector<4x256xf32>, vector<8x256xf32> -> vector<8x256xf32>
    %c0_22 = arith.constant 0 : index
    %c768 = arith.constant 768 : index
    %29 = vector.load %arg9[%c0_22, %c768] : memref<8x2048xf32, #tpu.memory_space<vmem>>, vector<8x256xf32>
    tpu.vector_store %arg9[%c0_22, %c768], %28 {strides = array<i32>} : memref<8x2048xf32, #tpu.memory_space<vmem>>, vector<8x256xf32>,
    %30 = vector.extract_strided_slice %8 {offsets = [0, 16], sizes = [8, 4], strides = [1, 1]} : vector<8x32xf32> to vector<8x4xf32>
    %31 = vector.extract_strided_slice %13 {offsets = [16, 0], sizes = [4, 256], strides = [1, 1]} : vector<32x256xf32> to vector<4x256xf32>
    %cst_23 = arith.constant dense<0.000000e+00> : vector<8x256xf32>
    %32 = tpu.matmul %30, %31, %cst_23 {dimension_numbers = #tpu.dot_dimension_numbers<[1], [0], [0], [1], [0, 0, 1, 1], [], []>} : vector<8x4xf32>, vector<4x256xf32>, vector<8x256xf32> -> vector<8x256xf32>
    %c0_24 = arith.constant 0 : index
    %c1024 = arith.constant 1024 : index
    %33 = vector.load %arg9[%c0_24, %c1024] : memref<8x2048xf32, #tpu.memory_space<vmem>>, vector<8x256xf32>
    tpu.vector_store %arg9[%c0_24, %c1024], %32 {strides = array<i32>} : memref<8x2048xf32, #tpu.memory_space<vmem>>, vector<8x256xf32>,
    %34 = vector.extract_strided_slice %8 {offsets = [0, 20], sizes = [8, 4], strides = [1, 1]} : vector<8x32xf32> to vector<8x4xf32>
    %35 = vector.extract_strided_slice %13 {offsets = [20, 0], sizes = [4, 256], strides = [1, 1]} : vector<32x256xf32> to vector<4x256xf32>
    %cst_25 = arith.constant dense<0.000000e+00> : vector<8x256xf32>
    %36 = tpu.matmul %34, %35, %cst_25 {dimension_numbers = #tpu.dot_dimension_numbers<[1], [0], [0], [1], [0, 0, 1, 1], [], []>} : vector<8x4xf32>, vector<4x256xf32>, vector<8x256xf32> -> vector<8x256xf32>
    %c0_26 = arith.constant 0 : index
    %c1280 = arith.constant 1280 : index
    %37 = vector.load %arg9[%c0_26, %c1280] : memref<8x2048xf32, #tpu.memory_space<vmem>>, vector<8x256xf32>
    tpu.vector_store %arg9[%c0_26, %c1280], %36 {strides = array<i32>} : memref<8x2048xf32, #tpu.memory_space<vmem>>, vector<8x256xf32>,
    %38 = vector.extract_strided_slice %8 {offsets = [0, 24], sizes = [8, 4], strides = [1, 1]} : vector<8x32xf32> to vector<8x4xf32>
    %39 = vector.extract_strided_slice %13 {offsets = [24, 0], sizes = [4, 256], strides = [1, 1]} : vector<32x256xf32> to vector<4x256xf32>
    %cst_27 = arith.constant dense<0.000000e+00> : vector<8x256xf32>
    %40 = tpu.matmul %38, %39, %cst_27 {dimension_numbers = #tpu.dot_dimension_numbers<[1], [0], [0], [1], [0, 0, 1, 1], [], []>} : vector<8x4xf32>, vector<4x256xf32>, vector<8x256xf32> -> vector<8x256xf32>
    %c0_28 = arith.constant 0 : index
    %c1536 = arith.constant 1536 : index
    %41 = vector.load %arg9[%c0_28, %c1536] : memref<8x2048xf32, #tpu.memory_space<vmem>>, vector<8x256xf32>
    tpu.vector_store %arg9[%c0_28, %c1536], %40 {strides = array<i32>} : memref<8x2048xf32, #tpu.memory_space<vmem>>, vector<8x256xf32>,
    %42 = vector.extract_strided_slice %8 {offsets = [0, 28], sizes = [8, 4], strides = [1, 1]} : vector<8x32xf32> to vector<8x4xf32>
    %43 = vector.extract_strided_slice %13 {offsets = [28, 0], sizes = [4, 256], strides = [1, 1]} : vector<32x256xf32> to vector<4x256xf32>
    %cst_29 = arith.constant dense<0.000000e+00> : vector<8x256xf32>
    %44 = tpu.matmul %42, %43, %cst_29 {dimension_numbers = #tpu.dot_dimension_numbers<[1], [0], [0], [1], [0, 0, 1, 1], [], []>} : vector<8x4xf32>, vector<4x256xf32>, vector<8x256xf32> -> vector<8x256xf32>
    %c0_30 = arith.constant 0 : index
    %c1792 = arith.constant 1792 : index
    %45 = vector.load %arg9[%c0_30, %c1792] : memref<8x2048xf32, #tpu.memory_space<vmem>>, vector<8x256xf32>
    tpu.vector_store %arg9[%c0_30, %c1792], %44 {strides = array<i32>} : memref<8x2048xf32, #tpu.memory_space<vmem>>, vector<8x256xf32>,
    %c0_31 = arith.constant 0 : index
    %c0_32 = arith.constant 0 : index
    %46 = vector.load %arg9[%c0_31, %c0_32] : memref<8x2048xf32, #tpu.memory_space<vmem>>, vector<8x2048xf32>
    %cst_33 = arith.constant dense<0xFF800000> : vector<8xf32>
    %47 = vector.multi_reduction <maximumf>, %46, %cst_33 [1] : vector<8x2048xf32> to vector<8xf32>
    %48 = vector.shape_cast %47 : vector<8xf32> to vector<8x1xf32>
    %49 = vector.broadcast %48 : vector<8x1xf32> to vector<8x2048xf32>
    %50 = arith.subf %46, %49 : vector<8x2048xf32>
    %51 = math.exp %50 : vector<8x2048xf32>
    %cst_34 = arith.constant dense<0.000000e+00> : vector<8xf32>
    %52 = vector.multi_reduction <add>, %51, %cst_34 [1] : vector<8x2048xf32> to vector<8xf32>
    %53 = vector.shape_cast %52 : vector<8xf32> to vector<8x1xf32>
    %54 = tpu.reciprocal %53 {approx = true} : vector<8x1xf32> -> vector<8x1xf32>
    %55 = vector.broadcast %54 : vector<8x1xf32> to vector<8x2048xf32>
    %56 = arith.mulf %51, %55 : vector<8x2048xf32>
    %57 = arith.truncf %56 : vector<8x2048xf32> to vector<8x2048xbf16>
    %c0_35 = arith.constant 0 : index
    %c0_36 = arith.constant 0 : index
    %c0_37 = arith.constant 0 : index
    %58 = vector.load %arg8[%c0_35, %c0_36, %c0_37] : memref<1x8x2048xbf16, #tpu.memory_space<vmem>>, vector<1x8x2048xbf16>
    %59 = vector.shape_cast %58 : vector<1x8x2048xbf16> to vector<8x2048xbf16>
    %60 = vector.shape_cast %57 : vector<8x2048xbf16> to vector<1x8x2048xbf16>
    tpu.vector_store %arg8[%c0_35, %c0_36, %c0_37], %60 {strides = array<i32>} : memref<1x8x2048xbf16, #tpu.memory_space<vmem>>, vector<1x8x2048xbf16>,
    return
  }
  func.func @transform_0(%arg0: i32, %arg1: i32) -> (i32, i32, i32) {
    %c0_i32 = arith.constant 0 : i32
    %c0_i32_0 = arith.constant 0 : i32
    return %arg0, %arg1, %c0_i32 : i32, i32, i32
  }
  func.func @transform_1(%arg0: i32, %arg1: i32) -> (i32, i32, i32) {
    %c0_i32 = arith.constant 0 : i32
    %c0_i32_0 = arith.constant 0 : i32
    %c0_i32_1 = arith.constant 0 : i32
    return %arg0, %c0_i32, %c0_i32_0 : i32, i32, i32
  }
  func.func @transform_2(%arg0: i32, %arg1: i32) -> (i32, i32) {
    %c0_i32 = arith.constant 0 : i32
    %c0_i32_0 = arith.constant 0 : i32
    %c0_i32_1 = arith.constant 0 : i32
    return %c0_i32, %c0_i32_0 : i32, i32
  }
  func.func @transform_3(%arg0: i32, %arg1: i32) -> (i32, i32) {
    %c0_i32 = arith.constant 0 : i32
    %c0_i32_0 = arith.constant 0 : i32
    %c0_i32_1 = arith.constant 0 : i32
    return %c0_i32, %c0_i32_0 : i32, i32
  }
  func.func @transform_4(%arg0: i32, %arg1: i32) -> (i32, i32) {
    %c0_i32 = arith.constant 0 : i32
    %c0_i32_0 = arith.constant 0 : i32
    %c0_i32_1 = arith.constant 0 : i32
    return %c0_i32, %c0_i32_0 : i32, i32
  }
  func.func @transform_5(%arg0: i32, %arg1: i32) -> (i32, i32) {
    %c0_i32 = arith.constant 0 : i32
    %c0_i32_0 = arith.constant 0 : i32
    %c0_i32_1 = arith.constant 0 : i32
    return %c0_i32, %c0_i32_0 : i32, i32
  }
  func.func @transform_6(%arg0: i32, %arg1: i32) -> (i32, i32, i32) {
    %c0_i32 = arith.constant 0 : i32
    %c0_i32_0 = arith.constant 0 : i32
    return %arg0, %arg1, %c0_i32 : i32, i32, i32
  }
}

</mosaic_0001>

<bundles_post_ra>
// kernel: tpu_custom_call.1
= control target key start
LH: loop header
LB: loop body
LE: loop exit
PB: predicated region body
PF: predicated region fallthrough
CT: control target
= control target key end

     0   :  { %11 = vsyncpa [#allocation4], 0  ;;  %s1967_s0 = inlined_call_operand.vmem [shape: f32[2,8,4], index: 0, kind: input, shape index: {}]   ;;  %s1968_s1 = inlined_call_operand.vmem [shape: f32[2,4,256], index: 1, kind: input, shape index: {}]   ;;  %s1969_s2 = inlined_call_operand.vmem [shape: f32[4,32], index: 2, kind: input, shape index: {}]   ;;  %s1970_s3 = inlined_call_operand.vmem [shape: f32[1,32], index: 3, kind: input, shape index: {}]   ;;  %s1971_s4 = inlined_call_operand.vmem [shape: f32[32,4], index: 4, kind: input, shape index: {}]   ;;  %s1972_s5 = inlined_call_operand.vmem [shape: f32[32,1], index: 5, kind: input, shape index: {}]   ;;  %s1973_s6 = inlined_call_operand.hbm [shape: bf16[2,8,2048], index: 6, kind: output, shape index: {}]  }
   0x1   :  { %13 = vsyncpa [#allocation4 + $0x1], 0  ;;  %s1765_s21 = smov 0   ;;  %s1767_s22 = smov 0  }
   0x2   :  { %s1769_s23 = smov 0   ;;  %s1771_s24 = smov 0  }
   0x3   :  { %s1773_s25 = smov 0   ;;  %s1775_s26 = smov 0  }
   0x4 LB: > { %s1467_s27 = sadd.s32 4294967295, %s1717_s26   ;;  %s1468_s28 = sadd.s32 4294967294, %s1717_s26   ;;  %s1717_s26 = sphi %s1775_s26, %s19_s26   ;;  %s1713_s25 = sphi %s1773_s25, %s1980_s25   ;;  %s1709_s24 = sphi %s1771_s24, %s1979_s24   ;;  %s1705_s23 = sphi %s1769_s23, %s1978_s23   ;;  %s1701_s22 = sphi %s1767_s22, %s1977_s22   ;;  %s1697_s21 = sphi %s1765_s21, %s1976_s21  }
   0x5   : > { %s31_s29 = sadd.s32 1, %s1713_s25  ;;  %s178_s30 = sadd.s32 1, %s1705_s23 }
   0x6   : > { %p33_p0 = scmp.ge.s32.totalorder %s31_s29, 2  ;;  %p188_p1 = scmp.ne.s32.totalorder %s1705_s23, %s1701_s22 }
   0x7   : > { %p189_p2 = scmp.eq.s32.totalorder %s1467_s27, 1  ;;  %p194_p3 = scmp.ne.s32.totalorder %s1701_s22, %s1697_s21 }
   0x8   : > { %s1982_s29 = smov (%p33_p0, %s31_s29), 0  ;;  %p195_p5 = scmp.eq.s32.totalorder %s1468_s28, 1 }
   0x9   : > { %p1805_p4 = por %p189_p2, %p188_p1  ;;  %s173_s8 = ssub.s32 %s1713_s25, %s1982_s29 }
   0xa   : > { %p1471_p6 = scmp.ge.s32.totalorder %s1717_s26, 1  ;;  %p176_p7 = scmp.eq.s32.totalorder %s173_s8, 0 }
   0xb   : > { %p1812_p8 = por %p195_p5, %p194_p3  ;;  %p243_p9 = scmp.lt.s32.totalorder %s1717_s26, 3 }
   0xc   : > { %s1818_s10 = scalar_select %p176_p7, %s1705_s23, %s178_s30  }
   0xd   : > { %p244_p10 = pnand %p1471_p6, %p243_p9 }
   0xe   : > { %p280_p11 = scmp.lt.s32.totalorder (!%p244_p10), %s1709_s24, 1  ;;  %s1722_s27 = smov (!%p244_p10), 120  }
   0xf   : > { %247 = sbr.rel (%p244_p10) target bundleno = 923 (0x39b), region = 44  ;;  %s1724_s11 = smov (!%p244_p10), 116  }
  0x10   : > { %s1725_s14 = smov (!%p244_p10), 108   ;;  %s1728_s17 = smov (!%p244_p10), 104  }
  0x11   : > { %s277_s18 = sand.u32 (!%p244_p10), 1, %s1701_s22   ;;  %s1531_s20 = sshll.u32 (!%p244_p10), %s1709_s24, 10 }
  0x12   : > { %s1729_s13 = smov (!%p244_p10), [#allocation3]  }
  0x14   : > { %v294_v0 = vld [vmem:[%s1969_s2] sm:$0xf]  ;;  %vm306_vm0 = vcmask 1043456   ;;  %v1719_v1 = vmov 0.0   ;;  %vm1720_vm1 = vmmov 0   ;;  %s281_s15 = scalar_select %p280_p11, %s1709_s24, 1 }
  0x15   : > { %1534 = vmatprep.subr.mxu0 %v1719_v1  ;;  %1536 = vmatprep.mubr.msk.f32.mxu0 %vm1720_vm1, %v1719_v1  ;;  %v384_v2 = vld [vmem:[%s1972_s5] sm:$0xff]  ;;  %v1721_v3 = vmov 0   ;;  %vm302_vm2 = vcmask 31744   ;;  %v385_v4 = vld [vmem:[%s1972_s5 + $0x8] sm:$0xff]  ;;  %v382_v10 = vld [vmem:[%s1971_s4 + $0x10] sm:$0xff]  ;;  %s1919_s24 = scalar_lea.hbm %s1973_s6, %s1531_s20 }
  0x16   : > { %1535 = vmatpush3.msk.msra.mxu0 %vm306_vm0, %v294_v0  ;;  %490 = vmatprep.mubr.f32.mxu1 %v1719_v1  ;;  %s1473_s16 = sshll.u32 %s281_s15, 3  ;;  %v380_v8 = vld [vmem:[%s1971_s4] sm:$0xff]  ;;  %v381_v9 = vld [vmem:[%s1971_s4 + $0x8] sm:$0xff]  ;;  %v383_v11 = vld [vmem:[%s1971_s4 + $0x18] sm:$0xff]  ;;  %s1726_s15 = smov 100  }
  0x17   : > { %1604 = vset.pattern.permute.xlu0 %v1721_v3  ;;  %1605 = vset.pattern.permute.xlu1 %v1721_v3  ;;  %s286_s19 = scalar_lea.vmem %s1967_s0, %s1473_s16  ;;  %s291_s28 = scalar_lea.vmem %s1968_s1, %s1473_s16  ;;  %v1476_v12 = vld [vmem:[%s1970_s3] ss:$0 sm:$0xff]  ;;  %v386_v18 = vld [vmem:[%s1972_s5 + $0x10] sm:$0xff]  ;;  %v387_v22 = vld [vmem:[%s1972_s5 + $0x18] sm:$0xff] }
  0x18   : > { %390 = vperm.xlu0 %1604, %v384_v2   ;;  %v292_v5 = vld [vmem:[%s286_s19] sm:$0xff]  ;;  %s1727_s16 = smov 112   ;;  %s1472_s19 = sshll.u32 %s277_s18, 6 }
  0x19   : > { %v293_v6 = vld [vmem:[%s291_s28] sm:$0xff]  ;;  %1537 = vmatmul.mubr.msk.f32.vlgmr.msra.gmra.mxu0 %vm302_vm2, %v292_v5  ;;  %s1723_s28 = smov 124  }
  0x1a   : > { %v409_v7 = vcombine.high %v293_v6, %v293_v6  ;;  %588 = vmatprep.mubr.f32.mxu0 %v1719_v1 }
  0x1c   : > { %395 = vperm.xlu0 %1604, %v385_v4   ;;  %1479 = vmatprep.subr.msk.mxu1 %vm306_vm0, %v409_v7 }
  0x1d   : > { %1480 = vmatpush1.msk.msra.mxu1 %vm306_vm0, %v293_v6 }
  0x1e   : > { %1481 = vmatmul.mubr.msk.f32.vlgmr.msra.gmra.mxu1 %vm302_vm2, %v380_v8 }
  0x1f   : > { %496 = vmatprep.mubr.f32.mxu1 %v1719_v1 }
  0x22   : > { %1482 = vmatmul.mubr.msk.f32.gmra.mxu1 %vm302_vm2, %v381_v9 }
  0x23   : > { %502 = vmatprep.mubr.f32.mxu1 %v1719_v1 }
  0x26   : > { %1483 = vmatmul.mubr.msk.f32.gmra.mxu1 %vm302_vm2, %v382_v10 }
  0x27   : > { %508 = vmatprep.mubr.f32.mxu1 %v1719_v1 }
  0x2a   : > { %1484 = vmatmul.mubr.msk.f32.gmra.mxu1 %vm302_vm2, %v383_v11 }
  0x2b   : > { %920 = vmatprep.mubr.f32.mxu1 %v1719_v1 }
  0x93   : > { %v391_v16 = vpop.permute.xlu0 %390 }
  0x97   : > { %v396_v26 = vpop.permute.xlu0 %395 }
  0xd9   : > { %v376_v13 = vpop.f32.mrf.mxu0 }
  0xda   : > { %v377_v14 = vadd.f32 %v1476_v12, %v376_v13 }
  0xdb   : > { %v1538_v15 = vpop.f32.mrf.mxu0 }
  0xdc   : > { %680 = vrot.lane.b32.xlu0 %v377_v14, %s1722_s27  ;;  %597 = vrot.lane.b32.xlu1 %v377_v14, %s1723_s28  ;;  %s279_s27 = scalar_lea.vmem [#allocation3], %s1472_s19 }
  0xdd   : > { %s1382_s28 = sshll.u32 %s279_s27, 4  ;;  %s1921_s28 = int_to_ptr.vmem [resolvable:$true] %s1382_s28 }
  0xde   : > { %v492_v17 = vpop.f32.mrf.mxu1  ;;  %s1641_s12 = scalar_lea.vmem %s1921_s28, 1024 }
  0xdf   : > { %v493_v19 = vadd.f32 %v492_v17, %v391_v16  ;;  %p1642_p12 = scmp.ne.s32.totalorder %s1921_s28, %s1641_s12 }
  0xe0   : > { %v494_v20 = vpop.f32.mrf.mxu1  ;;  %763 = vrot.lane.b32.xlu0 %v377_v14, %s1724_s11  ;;  %400 = vperm.xlu1 %1605, %v386_v18   ;;  %s1366_s11 = scalar_lea.sflag [#allocation4], %s277_s18 }
  0xe1   : > { %v495_v21 = vadd.f32 %v494_v20, %v391_v16  ;;  %v599_v24 = vrot.slane %v493_v19, 4  ;;  %p1643_p13 = pnand %p1642_p12, %p1805_p4 }
  0xe2   : > { %v498_v23 = vpop.f32.mrf.mxu1 }
  0xe3   : > { %v600_v25 = vrot.slane %v495_v21, 4  ;;  %1485 = vmatprep.subr.msk.mxu0 %vm306_vm0, %v495_v21  ;;  %v499_v29 = vadd.f32 %v498_v23, %v396_v26  ;;  %p1644_p0 = pneg %p1643_p13 }
  0xe4   : > { %1486 = vmatpush1.msk.msra.mxu0 %vm306_vm0, %v493_v19  ;;  %v500_v27 = vpop.f32.mrf.mxu1  ;;  %929 = vrot.lane.b32.xlu0 %v377_v14, %s1725_s14  ;;  %s1645_s14 = sshll.u32 %s1729_s13, 4  ;;  %s1646_s14 = int_to_ptr.vmem [resolvable:$false] %s1645_s14 }
  0xe5   : > { %405 = vperm.xlu1 %1605, %v387_v22   ;;  %v501_v28 = vadd.f32 %v500_v27, %v396_v26  ;;  %1487 = vmatmul.mubr.msk.f32.vlgmr.msra.gmra.mxu0 %vm302_vm2, %v377_v14  ;;  %v765_v32 = vrot.slane %v499_v29, 4  ;;  %p1648_p1 = scmp.lt.s32.totalorder %s1921_s28, %s1646_s14 }
  0xe6   : > { %1488 = vmatprep.subr.msk.mxu0 %vm306_vm0, %v600_v25  ;;  %671 = vmatprep.mubr.f32.mxu0 %v1719_v1  ;;  %v504_v34 = vpop.f32.mrf.mxu1 }
  0xe7   : > { %1489 = vmatpush1.msk.msra.mxu0 %vm306_vm0, %v599_v24  ;;  %v766_v30 = vrot.slane %v501_v28, 4 }
  0xe8   : > { %1491 = vmatprep.subr.msk.mxu0 %vm306_vm0, %v501_v28  ;;  %1095 = vrot.lane.b32.xlu0 %v377_v14, %s1726_s15  ;;  %v506_v35 = vpop.f32.mrf.mxu1  ;;  %s1647_s15 = scalar_lea.vmem %s1646_s14, 2048 }
  0xe9   : > { %846 = vrot.lane.b32.xlu1 %v377_v14, %s1727_s16  ;;  %p1649_p2 = scmp.lt.s32.totalorder %s1647_s15, %s1641_s12 }
  0xea   : > { %v510_v37 = vpop.f32.mrf.mxu1 }
  0xeb   : > { %p1650_p3 = por %p1649_p2, %p1648_p1 }
  0xec   : > { %v512_v41 = vpop.f32.mrf.mxu1 }
  0xed   : > { %1012 = vrot.lane.b32.xlu1 %v377_v14, %s1728_s17  ;;  %p1651_p5 = pnand %p1650_p3, %p1644_p0 }
 0x14e   : > { %v598_v31 = vpop.permute.xlu1 %597  ;;  %v681_v33 = vpop.permute.xlu0 %680 }
 0x14f   : > { %1490 = vmatmul.mubr.msk.f32.vlgmr.msra.gmra.mxu0 %vm302_vm2, %v598_v31 }
 0x150   : > { %1492 = vmatpush1.msk.msra.mxu0 %vm306_vm0, %v499_v29  ;;  %754 = vmatprep.mubr.f32.mxu0 %v1719_v1 }
 0x151   : > { %1494 = vmatprep.subr.msk.mxu0 %vm306_vm0, %v766_v30 }
 0x152   : > { %v764_v36 = vpop.permute.xlu0 %763 }
 0x153   : > { %1493 = vmatmul.mubr.msk.f32.vlgmr.msra.gmra.mxu0 %vm302_vm2, %v681_v33 }
 0x154   : > { %1495 = vmatpush1.msk.msra.mxu0 %vm306_vm0, %v765_v32  ;;  %837 = vmatprep.mubr.f32.mxu0 %v1719_v1 }
 0x156   : > { %v930_v44 = vpop.permute.xlu0 %929 }
 0x157   : > { %1496 = vmatmul.mubr.msk.f32.vlgmr.msra.gmra.mxu0 %vm302_vm2, %v764_v36 }
 0x158   : > { %1003 = vmatprep.mubr.f32.mxu0 %v1719_v1 }
 0x15a   : > { %v1096_v51 = vpop.permute.xlu0 %1095 }
 0x15b   : > { %v401_v38 = vpop.permute.xlu1 %400 }
 0x15c   : > { %v505_v39 = vadd.f32 %v504_v34, %v401_v38  ;;  %v507_v40 = vadd.f32 %v506_v35, %v401_v38 }
 0x15e   : > { %v931_v42 = vrot.slane %v505_v39, 4  ;;  %v932_v43 = vrot.slane %v507_v40, 4  ;;  %1497 = vmatprep.subr.msk.mxu1 %vm306_vm0, %v507_v40 }
 0x15f   : > { %1498 = vmatpush1.msk.msra.mxu1 %vm306_vm0, %v505_v39 }
 0x160   : > { %v406_v45 = vpop.permute.xlu1 %405  ;;  %1500 = vmatprep.subr.msk.mxu0 %vm306_vm0, %v932_v43 }
 0x161   : > { %v511_v46 = vadd.f32 %v510_v37, %v406_v45  ;;  %v513_v47 = vadd.f32 %v512_v41, %v406_v45  ;;  %1501 = vmatpush1.msk.msra.mxu0 %vm306_vm0, %v931_v42 }
 0x162   : > { %1502 = vmatmul.mubr.msk.f32.vlgmr.msra.gmra.mxu0 %vm302_vm2, %v930_v44 }
 0x163   : > { %v1097_v48 = vrot.slane %v511_v46, 4  ;;  %v1098_v49 = vrot.slane %v513_v47, 4  ;;  %1503 = vmatprep.subr.msk.mxu1 %vm306_vm0, %v513_v47  ;;  %1169 = vmatprep.mubr.f32.mxu0 %v1719_v1 }
 0x164   : > { %v847_v50 = vpop.permute.xlu1 %846 }
 0x165   : > { %1499 = vmatmul.mubr.msk.f32.vlgmr.msra.gmra.mxu1 %vm302_vm2, %v847_v50  ;;  %1506 = vmatprep.subr.msk.mxu0 %vm306_vm0, %v1098_v49 }
 0x166   : > { %1504 = vmatpush1.msk.msra.mxu1 %vm306_vm0, %v511_v46  ;;  %1507 = vmatpush1.msk.msra.mxu0 %vm306_vm0, %v1097_v48 }
 0x167   : > { %1508 = vmatmul.mubr.msk.f32.vlgmr.msra.gmra.mxu0 %vm302_vm2, %v1096_v51  ;;  %1086 = vmatprep.mubr.f32.mxu1 %v1719_v1 }
 0x168   : > { %v1013_v52 = vpop.permute.xlu1 %1012 }
 0x169   : > { %1505 = vmatmul.mubr.msk.f32.vlgmr.msra.gmra.mxu1 %vm302_vm2, %v1013_v52 }
 0x1a5   : > { %v590_v53 = vpop.f32.mrf.mxu0 }
 0x1a7   : > { %v592_v54 = vpop.f32.mrf.mxu0 }
 0x20f   : > { %v673_v55 = vpop.f32.mrf.mxu0 }
 0x211   : > { %v675_v56 = vpop.f32.mrf.mxu0 }
 0x213   : > { %v756_v57 = vpop.f32.mrf.mxu0 }
 0x214   : > { %v1194_v4 = vmax.f32 %v590_v53, %v756_v57 }
 0x215   : > { %v758_v58 = vpop.f32.mrf.mxu0 }
 0x216   : > { %v1195_v1 = vmax.f32 %v592_v54, %v758_v58 }
 0x217   : > { %v839_v59 = vpop.f32.mrf.mxu0 }
 0x218   : > { %v1196_v5 = vmax.f32 %v673_v55, %v839_v59 }
 0x219   : > { %v841_v60 = vpop.f32.mrf.mxu0 }
 0x21a   : > { %v1197_v0 = vmax.f32 %v675_v56, %v841_v60 }
 0x222   : > { %v1005_v61 = vpop.f32.mrf.mxu0 }
 0x223   : > { %v1200_v9 = vmax.f32 %v1196_v5, %v1005_v61 }
 0x224   : > { %v1007_v63 = vpop.f32.mrf.mxu0 }
 0x225   : > { %v922_v62 = vpop.f32.mrf.mxu1  ;;  %v1201_v6 = vmax.f32 %v1197_v0, %v1007_v63 }
 0x226   : > { %v1198_v10 = vmax.f32 %v1194_v4, %v922_v62 }
 0x227   : > { %v924_v2 = vpop.f32.mrf.mxu1  ;;  %v1904_v3 = vpop.f32.mrf.mxu0 }
 0x228   : > { %v1199_v11 = vmax.f32 %v1195_v1, %v924_v2  ;;  %v1204_v14 = vmax.f32 %v1200_v9, %v1904_v3 }
 0x229   : > { %v1088_v7 = vpop.f32.mrf.mxu1  ;;  %v1906_v8 = vpop.f32.mrf.mxu0 }
 0x22a   : > { %v1205_v12 = vmax.f32 %v1201_v6, %v1906_v8  ;;  %v1202_v15 = vmax.f32 %v1198_v10, %v1088_v7 }
 0x22b   : > { %v1090_v13 = vpop.f32.mrf.mxu1 }
 0x22c   : > { %v1203_v16 = vmax.f32 %v1199_v11, %v1090_v13  ;;  %v1207_v17 = vmax.f32 %v1204_v14, %v1205_v12 }
 0x22e   : > { %v1206_v18 = vmax.f32 %v1202_v15, %v1203_v16 }
 0x230   : > { %v1208_v19 = vmax.f32 %v1206_v18, %v1207_v17 }
 0x232   : > { %1209 = vmax.xlane.f32.xlu1 %v1208_v19 }
 0x2bb   : > { %v1210_v20 = vpop.xlane.xlu1 %1209 }
 0x2bc   : > { %v1211_v21 = vsub.f32 %v590_v53, %v1210_v20  ;;  %v1212_v22 = vsub.f32 %v592_v54, %v1210_v20  ;;  %v1213_v23 = vsub.f32 %v673_v55, %v1210_v20  ;;  %v1214_v24 = vsub.f32 %v675_v56, %v1210_v20 }
 0x2bd   : > { %v1215_v27 = vsub.f32 %v756_v57, %v1210_v20  ;;  %v1216_v29 = vsub.f32 %v758_v58, %v1210_v20  ;;  %v1217_v31 = vsub.f32 %v839_v59, %v1210_v20  ;;  %v1218_v33 = vsub.f32 %v841_v60, %v1210_v20 }
 0x2be   : > { %v1227_v25 = vmul.f32 1.442695, %v1211_v21  ;;  %v1229_v26 = vmul.f32 1.442695, %v1212_v22  ;;  %v1231_v28 = vmul.f32 1.442695, %v1213_v23  ;;  %v1219_v35 = vsub.f32 %v922_v62, %v1210_v20 }
 0x2bf   : > { %v1233_v30 = vmul.f32 1.442695, %v1214_v24  ;;  %v1235_v32 = vmul.f32 1.442695, %v1215_v27  ;;  %v1237_v34 = vmul.f32 1.442695, %v1216_v29  ;;  %v1220_v37 = vsub.f32 %v924_v2, %v1210_v20 }
 0x2c0   : > { %1607 = vpow2.f32 %v1227_v25  ;;  %v1239_v36 = vmul.f32 1.442695, %v1217_v31  ;;  %v1241_v38 = vmul.f32 1.442695, %v1218_v33  ;;  %v1221_v39 = vsub.f32 %v1005_v61, %v1210_v20 }
 0x2c1   : > { %1609 = vpow2.f32 %v1229_v26  ;;  %v1243_v40 = vmul.f32 1.442695, %v1219_v35  ;;  %v1222_v42 = vsub.f32 %v1007_v63, %v1210_v20  ;;  %v1245_v43 = vmul.f32 1.442695, %v1220_v37 }
 0x2c2   : > { %1611 = vpow2.f32 %v1231_v28  ;;  %v1223_v45 = vsub.f32 %v1088_v7, %v1210_v20  ;;  %v1247_v46 = vmul.f32 1.442695, %v1221_v39  ;;  %v1224_v49 = vsub.f32 %v1090_v13, %v1210_v20 }
 0x2c3   : > { %1613 = vpow2.f32 %v1233_v30  ;;  %v1249_v50 = vmul.f32 1.442695, %v1222_v42  ;;  %v1225_v53 = vsub.f32 %v1904_v3, %v1210_v20  ;;  %v1226_v57 = vsub.f32 %v1906_v8, %v1210_v20 }
 0x2c4   : > { %1615 = vpow2.f32 %v1235_v32  ;;  %v1251_v54 = vmul.f32 1.442695, %v1223_v45  ;;  %v1253_v58 = vmul.f32 1.442695, %v1224_v49 }
 0x2c5   : > { %1617 = vpow2.f32 %v1237_v34  ;;  %v1255_v61 = vmul.f32 1.442695, %v1225_v53  ;;  %v1257_v0 = vmul.f32 1.442695, %v1226_v57 }
 0x2c6   : > { %1619 = vpow2.f32 %v1239_v36 }
 0x2c7   : > { %1621 = vpow2.f32 %v1241_v38 }
 0x2c8   : > { %1623 = vpow2.f32 %v1243_v40 }
 0x2c9   : > { %1625 = vpow2.f32 %v1245_v43 }
 0x2ca   : > { %1627 = vpow2.f32 %v1247_v46 }
 0x2cb   : > { %1629 = vpow2.f32 %v1249_v50 }
 0x2cc   : > { %1631 = vpow2.f32 %v1251_v54 }
 0x2cd   : > { %v1608_v41 = vpop.eup %1607  ;;  %1633 = vpow2.f32 %v1253_v58 }
 0x2ce   : > { %v1610_v44 = vpop.eup %1609  ;;  %1635 = vpow2.f32 %v1255_v61 }
 0x2cf   : > { %v1259_v47 = vadd.f32 %v1610_v44, %v1608_v41  ;;  %v1612_v48 = vpop.eup %1611  ;;  %1637 = vpow2.f32 %v1257_v0 }
 0x2d0   : > { %v1614_v52 = vpop.eup %1613 }
 0x2d1   : > { %v1260_v51 = vadd.f32 %v1612_v48, %v1259_v47  ;;  %v1616_v56 = vpop.eup %1615 }
 0x2d2   : > { %v1618_v60 = vpop.eup %1617 }
 0x2d3   : > { %v1261_v55 = vadd.f32 %v1614_v52, %v1260_v51  ;;  %v1620_v63 = vpop.eup %1619 }
 0x2d4   : > { %v1622_v4 = vpop.eup %1621 }
 0x2d5   : > { %v1262_v59 = vadd.f32 %v1616_v56, %v1261_v55  ;;  %v1624_v1 = vpop.eup %1623 }
 0x2d6   : > { %v1626_v6 = vpop.eup %1625 }
 0x2d7   : > { %v1263_v62 = vadd.f32 %v1618_v60, %v1262_v59  ;;  %v1628_v8 = vpop.eup %1627 }
 0x2d8   : > { %v1630_v10 = vpop.eup %1629 }
 0x2d9   : > { %v1264_v2 = vadd.f32 %v1620_v63, %v1263_v62  ;;  %v1632_v12 = vpop.eup %1631 }
 0x2da   : > { %v1634_v14 = vpop.eup %1633 }
 0x2db   : > { %v1265_v3 = vadd.f32 %v1622_v4, %v1264_v2  ;;  %v1636_v16 = vpop.eup %1635 }
 0x2dc   : > { %v1638_v18 = vpop.eup %1637 }
 0x2dd   : > { %v1266_v5 = vadd.f32 %v1624_v1, %v1265_v3 }
 0x2df   : > { %v1267_v7 = vadd.f32 %v1626_v6, %v1266_v5 }
 0x2e1   : > { %v1268_v9 = vadd.f32 %v1628_v8, %v1267_v7 }
 0x2e3   : > { %v1269_v11 = vadd.f32 %v1630_v10, %v1268_v9 }
 0x2e5   : > { %v1270_v13 = vadd.f32 %v1632_v12, %v1269_v11 }
 0x2e7   : > { %v1271_v15 = vadd.f32 %v1634_v14, %v1270_v13 }
 0x2e9   : > { %v1272_v17 = vadd.f32 %v1636_v16, %v1271_v15 }
 0x2eb   : > { %v1273_v19 = vadd.f32 %v1638_v18, %v1272_v17 }
 0x2ed   : > { %1274 = vadd.xlane.f32.xlu0 %v1273_v19 }
 0x376   : > { %v1275_v20 = vpop.xlane.xlu0 %1274 }
 0x377   : > { %1639 = vrcp.f32 %v1275_v20 }
 0x384   : > { %v1640_v21 = vpop.eup %1639 }
 0x385   : > { %v1277_v22 = vmul.f32 %v1640_v21, %v1608_v41  ;;  %v1278_v23 = vmul.f32 %v1640_v21, %v1610_v44  ;;  %v1279_v24 = vmul.f32 %v1640_v21, %v1612_v48  ;;  %v1280_v25 = vmul.f32 %v1640_v21, %v1614_v52 }
 0x386   : > { %v1281_v26 = vmul.f32 %v1640_v21, %v1616_v56  ;;  %v1282_v27 = vmul.f32 %v1640_v21, %v1618_v60  ;;  %v1283_v28 = vmul.f32 %v1640_v21, %v1620_v63  ;;  %v1284_v29 = vmul.f32 %v1640_v21, %v1622_v4 }
 0x387   : > { %v1285_v30 = vmul.f32 %v1640_v21, %v1624_v1  ;;  %v1286_v31 = vmul.f32 %v1640_v21, %v1626_v6  ;;  %v1287_v32 = vmul.f32 %v1640_v21, %v1628_v8  ;;  %v1288_v33 = vmul.f32 %v1640_v21, %v1630_v10 }
 0x388   : > { %v1289_v34 = vmul.f32 %v1640_v21, %v1632_v12  ;;  %v1290_v35 = vmul.f32 %v1640_v21, %v1634_v14  ;;  %v1291_v36 = vmul.f32 %v1640_v21, %v1636_v16  ;;  %v1292_v37 = vmul.f32 %v1640_v21, %v1638_v18 }
 0x389   : > { %v1523_v38 = vpack.c.bf16 %v1278_v23, %v1277_v22  ;;  %v1524_v39 = vpack.c.bf16 %v1280_v25, %v1279_v24  ;;  %v1525_v40 = vpack.c.bf16 %v1282_v27, %v1281_v26  ;;  %v1526_v41 = vpack.c.bf16 %v1284_v29, %v1283_v28 }
 0x38a   : > { %v1527_v42 = vpack.c.bf16 %v1286_v31, %v1285_v30  ;;  %v1528_v43 = vpack.c.bf16 %v1288_v33, %v1287_v32  ;;  %v1529_v44 = vpack.c.bf16 %v1290_v35, %v1289_v34  ;;  %v1530_v45 = vpack.c.bf16 %v1292_v37, %v1291_v36 }
 0x38b   : > { %1357 = vst [vmem:[%s279_s27] sm:$0xff] %v1523_v38  ;;  %1358 = vst [vmem:[%s279_s27 + $0x8] sm:$0xff] %v1524_v39 }
 0x38c   : > { %1359 = vst [vmem:[%s279_s27 + $0x10] sm:$0xff] %v1525_v40  ;;  %1360 = vst [vmem:[%s279_s27 + $0x18] sm:$0xff] %v1526_v41 }
 0x38d   : > { %1361 = vst [vmem:[%s279_s27 + $0x20] sm:$0xff] %v1527_v42  ;;  %1362 = vst [vmem:[%s279_s27 + $0x28] sm:$0xff] %v1528_v43 }
 0x38e   : > { %1363 = vst [vmem:[%s279_s27 + $0x30] sm:$0xff] %v1529_v44  ;;  %1364 = vst [vmem:[%s279_s27 + $0x38] sm:$0xff] %v1530_v45 }
 0x38f   : > { %1654 = shalt.err (!%p1651_p5)
}
 0x390   : > { %s1655_s16 = scalar_lea.hbm %s1919_s24, 1024  ;;  %s1659_s19 = scalar_lea.hbm %s1973_s6, 2048 }
 0x391   : > { %p1656_p6 = scmp.ne.s32.totalorder %s1919_s24, %s1655_s16  ;;  %p1660_p10 = scmp.lt.s32.totalorder %s1919_s24, %s1973_s6 }
 0x392   : > { %p1661_p11 = scmp.lt.s32.totalorder %s1659_s19, %s1655_s16 }
 0x393   : > { %p1657_p7 = pnand %p1656_p6, %p1805_p4 }
 0x394   : > { %p1662_p12 = por %p1661_p11, %p1660_p10 }
 0x395   : > { %p1658_p9 = pneg %p1657_p7 }
 0x397   : > { %p1663_p13 = pnand %p1662_p12, %p1658_p9 }
 0x399   : > { %1666 = shalt.err (!%p1663_p13)
}
 0x39a   : > { %1539 = dma.vmem_to_hbm [thread:$0]  (%p1805_p4), %s1921_s28, 1024, %s1919_s24, %s1366_s11  }
 0x39b PF: > { %p1545_p0 = scmp.ge.s32.totalorder %s1717_s26, 2  ;;  %s1394_s30 = sand.u32 1, %s1697_s21  }
 0x39c   : > { %s1395_s8 = scalar_lea.sflag [#allocation4], %s1394_s30 }
 0x39d   : > { %p1542_p1 = pnand %p1545_p0, %p1812_p8 }
 0x39f   : > { %p1543_p2 = pneg %p1542_p1 }
 0x3a1   : > { %1692 = dma.done.wait (%p1543_p2), %s1395_s8, 1024  }
 0x3a2   : > { %1694 = vsyncadd (%p1543_p2), %s1395_s8, 4294966272  ;;  %s19_s26 = sadd.s32 1, %s1717_s26   ;;  %s1976_s21 = smov %s1701_s22 }
 0x3a3   : > { %p16_p3 = scmp.ge.s32.totalorder %s19_s26, 4   ;;  %s1977_s22 = smov %s1705_s23 }
 0x3a4   : > { %s1978_s23 = smov %s1818_s10  ;;  %s1979_s24 = smov %s1713_s25 }
 0x3a5   : > { %s1980_s25 = smov %s1982_s29  ;;  %18 = sbr.rel (!%p16_p3) target bundleno = 4 (0x4), region = 82 }
 0x3aa   :  { %1400 = vsyncpa [#allocation4], 1 }
 0x3ab   :  { %1402 = vsyncpa [#allocation4 + $0x1], 1 }

</bundles_post_ra>
